<compile_context>
chip_gen: v7x
topology: tpu7x:2x2x1
jax: 0.10.0
libtpu: 0.0.40
codegen_flags: <defaults>
</compile_context>

<pallas_src>
import jax
import jax.numpy as jnp
import numpy as np
from jax.experimental import pallas as pl
from jax.experimental.pallas import tpu as pltpu  # noqa: F401  (kept for larger-size variants)


# ----------------------------------------------------------------------------
# Pallas kernel: whole batch in one invocation, everything in (N*C, H*W) form.
# ----------------------------------------------------------------------------
def _lfm_kernel(x_ref, kf_ref, ki_ref, w1_ref, w2_ref, b_ref, o_ref):
    f32 = jnp.float32
    bf16 = jnp.bfloat16
    nc, hw = x_ref.shape                                   # (N*C, H*W)

    x = x_ref[...]                                         # (NC, HW) f32

    # ---- fft2 + (1 - gaussian) mask: ONE bf16 matmul, [Re | Im] columns ----
    yri = jnp.dot(x.astype(bf16), kf_ref[...],
                  preferred_element_type=f32)              # (NC, 2*HW)

    # ---- concat([real, imag], channel) + conv1 (1x1) + relu: ONE matmul ----
    # y_stack rows: [all real channels (NC) ; all imag channels (NC)];
    # w1 columns were permuted in make_params to match this layout.
    y_stack = jnp.concatenate([yri[:, :hw], yri[:, hw:]], axis=0)   # (2NC, HW)
    h1 = jnp.maximum(
        jnp.dot(w1_ref[...], y_stack, preferred_element_type=f32) + b_ref[0],
        0.0)                                                        # (2NC, HW)

    # ---- conv2 (1x1): ONE matmul; rows pre-permuted to [U (real); V (imag)] -
    uv = jnp.dot(w2_ref[...], h1, preferred_element_type=f32) + b_ref[1]

    # ---- real(ifft2(u + i v)): ONE bf16 matmul against stacked inverse DFT --
    uv_col = jnp.concatenate([uv[:nc, :], uv[nc:, :]], axis=1)      # (NC, 2*HW)
    z = jnp.dot(uv_col.astype(bf16), ki_ref[...],
                preferred_element_type=f32)                         # (NC, HW)

    # ---- residual ----------------------------------------------------------
    o_ref[...] = x + z


# ----------------------------------------------------------------------------
# Wrapper: NCHW in/out, flattened to (N*C, H*W) for the kernel (reshape only).
# ----------------------------------------------------------------------------
def lfm_pallas(x_nchw, params):
    N, C, H, W = x_nchw.shape
    HW = H * W
    NC = N * C
    x_flat = x_nchw.reshape(NC, HW).astype(jnp.float32)

    kf, ki = params["kf"], params["ki"]
    w1s, w2s, b_all = params["w1s"], params["w2s"], params["b_all"]

    flops = 2 * (NC * HW * 2 * HW            # masked forward DFT
                 + (2 * NC) ** 2 * HW        # conv1
                 + (2 * NC) ** 2 * HW        # conv2
                 + NC * 2 * HW * HW)         # inverse DFT
    bytes_accessed = (sum(int(np.prod(a.shape)) * a.dtype.itemsize
                          for a in (x_flat, kf, ki, w1s, w2s, b_all))
                      + NC * HW * 4)         # output

    out_flat = pl.pallas_call(
        _lfm_kernel,
        out_shape=jax.ShapeDtypeStruct((NC, HW), jnp.float32),
        cost_estimate=pl.CostEstimate(flops=flops, transcendentals=0,
                                      bytes_accessed=bytes_accessed),
    )(x_flat, kf, ki, w1s, w2s, b_all)

    return out_flat.reshape(N, C, H, W)


# ----------------------------------------------------------------------------
# Parameter construction: DFT matrices, mask fold, block-diag conv weights.
# ----------------------------------------------------------------------------
def make_params(key, batch, num_channels, H, W, sigma=7.0):
    N, C = batch, num_channels
    C2, NC, HW = 2 * C, batch * num_channels, H * W
    k1, k2, k3, k4 = jax.random.split(key, 4)

    # 1x1 conv weights / biases (Conv2d(2C, 2C, 1): weight (out, in))
    w1 = 0.2 * jax.random.normal(k1, (C2, C2), jnp.float32)
    b1 = 0.1 * jax.random.normal(k2, (C2,), jnp.float32)
    w2 = 0.2 * jax.random.normal(k3, (C2, C2), jnp.float32)
    b2 = 0.1 * jax.random.normal(k4, (C2,), jnp.float32)
    w1n, b1n = np.asarray(w1, np.float64), np.asarray(b1, np.float64)
    w2n, b2n = np.asarray(w2, np.float64), np.asarray(b2, np.float64)

    # kron(DFT_H, DFT_W): K[(k,l),(m,n)] = exp(-2*pi*i*(k*m/H + l*n/W)).
    # Exact twiddle angles via integer arithmetic mod H*W; symmetric matrix.
    km = np.arange(H)[:, None] * np.arange(H)[None, :]
    ln = np.arange(W)[:, None] * np.arange(W)[None, :]
    num = (km[:, None, :, None] * W + ln[None, :, None, :] * H) % HW
    theta = (2.0 * np.pi / HW) * num.reshape(HW, HW).astype(np.float64)
    ka, kb = np.cos(theta), -np.sin(theta)                  # Re(K), Im(K)

    # (1 - gaussian) mask folded into forward DFT columns (unshifted, as torch).
    yv, xv = np.meshgrid(np.arange(H), np.arange(W), indexing="ij")
    g = np.exp(-(((yv - H // 2) ** 2 + (xv - W // 2) ** 2) / (2.0 * sigma ** 2)))
    filt = (1.0 - g).reshape(HW)

    kf = np.concatenate([ka * filt, kb * filt], axis=1)     # (HW, 2HW) fwd + mask
    ki = np.concatenate([ka / HW, kb / HW], axis=0)         # (2HW, HW) inv + /HW

    # Block-diagonal (over batch) conv weights, rows/columns permuted so the
    # kernel's stacked layouts line up:
    #   y_stack row j:  j <  NC -> (n=j//C, c=j%C) real ; j >= NC -> imag
    #   h1 row:         n*2C + o
    #   uv row:         first NC -> U (out channel c < C), last NC -> V
    w1s = np.zeros((2 * NC, 2 * NC), np.float64)
    w2s = np.zeros((2 * NC, 2 * NC), np.float64)
    b1s = np.zeros((2 * NC,), np.float64)
    b2s = np.zeros((2 * NC,), np.float64)
    for n in range(N):
        for o in range(C2):
            w1s[n * C2 + o, n * C:(n + 1) * C] = w1n[o, :C]          # real cols
            w1s[n * C2 + o, NC + n * C:NC + (n + 1) * C] = w1n[o, C:]  # imag cols
            b1s[n * C2 + o] = b1n[o]
        for c in range(C):
            w2s[n * C + c, n * C2:(n + 1) * C2] = w2n[c, :]          # U rows
            w2s[NC + n * C + c, n * C2:(n + 1) * C2] = w2n[C + c, :]  # V rows
            b2s[n * C + c] = b2n[c]
            b2s[NC + n * C + c] = b2n[C + c]

    params = dict(
        kf=jnp.asarray(kf, jnp.bfloat16),        # bf16 constants: half the DMA,
        ki=jnp.asarray(ki, jnp.bfloat16),        # single-pass MXU; f32 accumulate
        w1s=jnp.asarray(w1s, jnp.float32),
        w2s=jnp.asarray(w2s, jnp.float32),
        b_all=jnp.asarray(np.stack([b1s, b2s])[:, :, None], jnp.float32),  # (2, 2NC, 1)
    )
    raw = dict(w1=w1, b1=b1, w2=w2, b2=b2, sigma=sigma)
    return params, raw


# ----------------------------------------------------------------------------
# Independent float64 numpy reference (true FFT path, exactly the torch math).
# ----------------------------------------------------------------------------
def lfm_ref(x, raw):
    x64 = np.asarray(x, np.float64)
    w1 = np.asarray(raw["w1"], np.float64); b1 = np.asarray(raw["b1"], np.float64)
    w2 = np.asarray(raw["w2"], np.float64); b2 = np.asarray(raw["b2"], np.float64)
    sigma = float(raw["sigma"])
    N, C, H, W = x64.shape

    y = np.fft.fft2(x64, axes=(-2, -1))
    yv, xv = np.meshgrid(np.arange(H), np.arange(W), indexing="ij")
    g = np.exp(-(((yv - H // 2) ** 2 + (xv - W // 2) ** 2) / (2.0 * sigma ** 2)))
    y = y * (1.0 - g)[None, None]

    y_f = np.concatenate([y.real, y.imag], axis=1)                  # (N, 2C, H, W)
    h1 = np.maximum(np.einsum("oc,nchw->nohw", w1, y_f)
                    + b1[None, :, None, None], 0.0)
    h2 = np.einsum("oc,nchw->nohw", w2, h1) + b2[None, :, None, None]
    yr, yi = h2[:, :C], h2[:, C:]
    z = np.real(np.fft.ifft2(yr + 1j * yi, axes=(-2, -1)))          # .float() drops imag
    return (x64 + z).astype(np.float32)


if __name__ == "__main__":
    # LFM(num_channels=4) applied to a (batch=2, channels=4, 16x16) input.
    N, num_channels, H, W = 2, 4, 16, 16
    key = jax.random.PRNGKey(0)
    kx, kp = jax.random.split(key)
    x = jax.random.normal(kx, (N, num_channels, H, W), jnp.float32)

    params, raw = make_params(kp, N, num_channels, H, W, sigma=7.0)

    out = jax.block_until_ready(lfm_pallas(x, params))

    ref = lfm_ref(x, raw)
    # bf16 DFT operands (f32 accumulation) track the f64 FFT reference to
    # ~1e-2 worst-case on O(1) outputs; 3e-2 keeps margin while still being a
    # meaningful correctness check (f32 constants pass at 5e-3).
    np.testing.assert_allclose(np.asarray(out), ref, rtol=3e-2, atol=3e-2)
    print("KERNEL_OK")
</pallas_src>

<mosaic_0001>
module attributes {stable_mosaic.version = 11 : i64} {
  func.func @_lfm_kernel(%arg0: memref<8x256xf32, #tpu.memory_space<vmem>>, %arg1: memref<256x512xbf16, #tpu.memory_space<vmem>>, %arg2: memref<512x256xbf16, #tpu.memory_space<vmem>>, %arg3: memref<16x16xf32, #tpu.memory_space<vmem>>, %arg4: memref<16x16xf32, #tpu.memory_space<vmem>>, %arg5: memref<2x16x1xf32, #tpu.memory_space<vmem>>, %arg6: memref<8x256xf32, #tpu.memory_space<vmem>>) attributes {dimension_semantics = [], scalar_prefetch = 0 : i64, scratch_operands = 0 : i64, tpu.core_type = #tpu.core_type<tc>} {
    %c0 = arith.constant 0 : index
    %c0_0 = arith.constant 0 : index
    %0 = vector.load %arg0[%c0, %c0_0] : memref<8x256xf32, #tpu.memory_space<vmem>>, vector<8x256xf32>
    %1 = arith.truncf %0 : vector<8x256xf32> to vector<8x256xbf16>
    %c0_1 = arith.constant 0 : index
    %c0_2 = arith.constant 0 : index
    %2 = vector.load %arg1[%c0_1, %c0_2] : memref<256x512xbf16, #tpu.memory_space<vmem>>, vector<256x512xbf16>
    %cst = arith.constant dense<0.000000e+00> : vector<8x512xf32>
    %3 = tpu.matmul %1, %2, %cst {dimension_numbers = #tpu.dot_dimension_numbers<[1], [0], [0], [1], [0, 0, 1, 1], [], []>} : vector<8x256xbf16>, vector<256x512xbf16>, vector<8x512xf32> -> vector<8x512xf32>
    %4 = vector.extract_strided_slice %3 {offsets = [0, 0], sizes = [8, 256], strides = [1, 1]} : vector<8x512xf32> to vector<8x256xf32>
    %5 = vector.extract_strided_slice %3 {offsets = [0, 256], sizes = [8, 256], strides = [1, 1]} : vector<8x512xf32> to vector<8x256xf32>
    %6 = tpu.concatenate %4, %5 in 0 : vector<8x256xf32>, vector<8x256xf32> -> vector<16x256xf32>
    %c0_3 = arith.constant 0 : index
    %c0_4 = arith.constant 0 : index
    %7 = vector.load %arg3[%c0_3, %c0_4] : memref<16x16xf32, #tpu.memory_space<vmem>>, vector<16x16xf32>
    %cst_5 = arith.constant dense<0.000000e+00> : vector<16x256xf32>
    %8 = tpu.matmul %7, %6, %cst_5 {dimension_numbers = #tpu.dot_dimension_numbers<[1], [0], [0], [1], [0, 0, 1, 1], [], []>} : vector<16x16xf32>, vector<16x256xf32>, vector<16x256xf32> -> vector<16x256xf32>
    %c0_6 = arith.constant 0 : index
    %c0_7 = arith.constant 0 : index
    %c0_8 = arith.constant 0 : index
    %9 = vector.load %arg5[%c0_6, %c0_7, %c0_8] : memref<2x16x1xf32, #tpu.memory_space<vmem>>, vector<1x16x1xf32>
    %10 = vector.shape_cast %9 : vector<1x16x1xf32> to vector<16x1xf32>
    %11 = vector.broadcast %10 : vector<16x1xf32> to vector<16x256xf32>
    %12 = arith.addf %8, %11 : vector<16x256xf32>
    %cst_9 = arith.constant 0.000000e+00 : f32
    %13 = vector.broadcast %cst_9 : f32 to vector<16x256xf32>
    %14 = arith.maximumf %12, %13 : vector<16x256xf32>
    %c0_10 = arith.constant 0 : index
    %c0_11 = arith.constant 0 : index
    %15 = vector.load %arg4[%c0_10, %c0_11] : memref<16x16xf32, #tpu.memory_space<vmem>>, vector<16x16xf32>
    %cst_12 = arith.constant dense<0.000000e+00> : vector<16x256xf32>
    %16 = tpu.matmul %15, %14, %cst_12 {dimension_numbers = #tpu.dot_dimension_numbers<[1], [0], [0], [1], [0, 0, 1, 1], [], []>} : vector<16x16xf32>, vector<16x256xf32>, vector<16x256xf32> -> vector<16x256xf32>
    %c1 = arith.constant 1 : index
    %c0_13 = arith.constant 0 : index
    %c0_14 = arith.constant 0 : index
    %17 = vector.load %arg5[%c1, %c0_13, %c0_14] : memref<2x16x1xf32, #tpu.memory_space<vmem>>, vector<1x16x1xf32>
    %18 = vector.shape_cast %17 : vector<1x16x1xf32> to vector<16x1xf32>
    %19 = vector.broadcast %18 : vector<16x1xf32> to vector<16x256xf32>
    %20 = arith.addf %16, %19 : vector<16x256xf32>
    %21 = vector.extract_strided_slice %20 {offsets = [0, 0], sizes = [8, 256], strides = [1, 1]} : vector<16x256xf32> to vector<8x256xf32>
    %22 = vector.extract_strided_slice %20 {offsets = [8, 0], sizes = [8, 256], strides = [1, 1]} : vector<16x256xf32> to vector<8x256xf32>
    %23 = tpu.concatenate %21, %22 in 1 : vector<8x256xf32>, vector<8x256xf32> -> vector<8x512xf32>
    %24 = arith.truncf %23 : vector<8x512xf32> to vector<8x512xbf16>
    %c0_15 = arith.constant 0 : index
    %c0_16 = arith.constant 0 : index
    %25 = vector.load %arg2[%c0_15, %c0_16] : memref<512x256xbf16, #tpu.memory_space<vmem>>, vector<512x256xbf16>
    %cst_17 = arith.constant dense<0.000000e+00> : vector<8x256xf32>
    %26 = tpu.matmul %24, %25, %cst_17 {dimension_numbers = #tpu.dot_dimension_numbers<[1], [0], [0], [1], [0, 0, 1, 1], [], []>} : vector<8x512xbf16>, vector<512x256xbf16>, vector<8x256xf32> -> vector<8x256xf32>
    %27 = arith.addf %0, %26 : vector<8x256xf32>
    %c0_18 = arith.constant 0 : index
    %c0_19 = arith.constant 0 : index
    %28 = vector.load %arg6[%c0_18, %c0_19] : memref<8x256xf32, #tpu.memory_space<vmem>>, vector<8x256xf32>
    tpu.vector_store %arg6[%c0_18, %c0_19], %27 {strides = array<i32>} : memref<8x256xf32, #tpu.memory_space<vmem>>, vector<8x256xf32>,
    return
  }
}

</mosaic_0001>

<bundles_post_ra>
// kernel: tpu_custom_call.1
= control target key start
LH: loop header
LB: loop body
LE: loop exit
PB: predicated region body
PF: predicated region fallthrough
CT: control target
= control target key end

     0   :  { %11 = vsyncpa [#allocation3], 0  ;;  %s1757_s0 = inlined_call_operand.vmem [shape: f32[8,256], index: 0, kind: input, shape index: {}]   ;;  %s1758_s1 = inlined_call_operand.hbm [shape: bf16[256,512], index: 1, kind: input, shape index: {}]   ;;  %s1759_s2 = inlined_call_operand.hbm [shape: bf16[512,256], index: 2, kind: input, shape index: {}]   ;;  %s1760_s3 = inlined_call_operand.vmem [shape: f32[16,16], index: 3, kind: input, shape index: {}]   ;;  %s1761_s4 = inlined_call_operand.vmem [shape: f32[16,16], index: 4, kind: input, shape index: {}]   ;;  %s1762_s5 = inlined_call_operand.vmem [shape: f32[2,16,1], index: 5, kind: input, shape index: {}]   ;;  %s1763_s6 = inlined_call_operand.hbm [shape: f32[8,256], index: 6, kind: output, shape index: {}]  }
   0x1   :  { %12 = vsyncpa [#allocation6], 0 }
   0x2   :  { %13 = vsyncpa [#allocation4], 0  ;;  %s1629_s21 = smov [#allocation2]   ;;  %s1557_s25 = scalar_lea.hbm %s1758_s1, 8192 }
   0x3   :  { %s21_s22 = sshll.u32 %s1629_s21, 4  ;;  %p1558_p0 = scmp.ne.s32.totalorder %s1758_s1, %s1557_s25  ;;  %s22_s22 = int_to_ptr.vmem [resolvable:$true] %s21_s22 }
   0x4   :  { %p1561_p1 = scmp.lt.u32.totalorder %s1557_s25, %s1758_s1 }
   0x6   :  { %p1563_p2 = pnand %p1561_p1, %p1558_p0 }
   0x8   :  { %1566 = shalt.err (!%p1563_p2)
}
   0x9   :  { %s1567_s30 = scalar_lea.vmem %s22_s22, 8192  ;;  %p1572_p4 = scmp.lt.s32.totalorder %s22_s22, %s22_s22 }
   0xa   :  { %p1568_p3 = scmp.ne.s32.totalorder %s22_s22, %s1567_s30  ;;  %p1573_p5 = scmp.lt.s32.totalorder %s1567_s30, %s1567_s30 }
   0xc   :  { %p1574_p6 = por %p1573_p5, %p1572_p4 }
   0xe   :  { %p1575_p7 = pnand %p1574_p6, %p1568_p3 }
  0x10   :  { %1578 = shalt.err (!%p1575_p7)
}
  0x11   :  { %s1630_s7 = smov 256   ;;  %s1631_s8 = smov 16  }
  0x12   :  { %27 = dma.hbm_to_vmem [thread:$0]  %s1758_s1, 8192, %s22_s22, [#allocation3], %s1630_s7, %s1630_s7, %s1631_s8  }
  0x13   :  { %s1632_s11 = smov [#allocation5]   ;;  %s1579_s15 = scalar_lea.hbm %s1759_s2, 8192 }
  0x14   :  { %s33_s12 = sshll.u32 %s1632_s11, 4  ;;  %p1580_p8 = scmp.ne.s32.totalorder %s1759_s2, %s1579_s15  ;;  %s34_s12 = int_to_ptr.vmem [resolvable:$true] %s33_s12 }
  0x15   :  { %p1583_p9 = scmp.lt.u32.totalorder %s1579_s15, %s1759_s2 }
  0x17   :  { %p1585_p10 = pnand %p1583_p9, %p1580_p8 }
  0x19   :  { %1588 = shalt.err (!%p1585_p10)
}
  0x1a   :  { %s1589_s20 = scalar_lea.vmem %s34_s12, 8192  ;;  %p1594_p12 = scmp.lt.s32.totalorder %s34_s12, %s34_s12 }
  0x1b   :  { %p1590_p11 = scmp.ne.s32.totalorder %s34_s12, %s1589_s20  ;;  %p1595_p13 = scmp.lt.s32.totalorder %s1589_s20, %s1589_s20 }
  0x1d   :  { %p1596_p0 = por %p1595_p13, %p1594_p12 }
  0x1f   :  { %p1597_p1 = pnand %p1596_p0, %p1590_p11 }
  0x21   :  { %1600 = shalt.err (!%p1597_p1)
}
  0x22   :  { %s1633_s1 = smov 128   ;;  %s1634_s21 = smov 8  }
  0x23   :  { %39 = dma.hbm_to_vmem [thread:$0]  %s1759_s2, 8192, %s34_s12, [#allocation6], %s1633_s1, %s1633_s1, %s1634_s21  }
  0x24   :  { %1623 = dma.done.wait [#allocation3], 8192  }
  0x25   :  { %1624 = vsyncadd [#allocation3], 4294959104 }
  0x26   :  { %1625 = dma.done.wait [#allocation6], 8192  }
  0x27   :  { %1626 = vsyncadd [#allocation6], 4294959104  ;;  %v1365_v0 = vld [vmem:[#allocation2 + $0x4] ss:$16 sps:$4 sm:$0xff]   ;;  %v1367_v1 = vld [vmem:[#allocation2 + $0xc] ss:$16 sps:$4 sm:$0xff]  }
  0x28   :  { %440 = vmatprep.subr.bf16.mxu0 %v1365_v0  ;;  %v1369_v2 = vld [vmem:[#allocation2] ss:$16 sps:$4 sm:$0xff]   ;;  %v1370_v3 = vld [vmem:[#allocation2 + $0x8] ss:$16 sps:$4 sm:$0xff]   ;;  %481 = vmatprep.subr.bf16.mxu1 %v1367_v1  ;;  %v1371_v4 = vld [vmem:[#allocation2 + $0x24] ss:$16 sps:$4 sm:$0xff]  }
  0x29   :  { %441 = vmatpush1.bf16.msra.mxu0 %v1369_v2  ;;  %482 = vmatpush1.bf16.msra.mxu1 %v1370_v3  ;;  %v1373_v5 = vld [vmem:[#allocation2 + $0x2c] ss:$16 sps:$4 sm:$0xff]   ;;  %v1375_v6 = vld [vmem:[#allocation2 + $0x20] ss:$16 sps:$4 sm:$0xff]   ;;  %v1376_v7 = vld [vmem:[#allocation2 + $0x28] ss:$16 sps:$4 sm:$0xff]  }
  0x2a   :  { %442 = vmatprep.subr.bf16.mxu0 %v1371_v4  ;;  %483 = vmatprep.subr.bf16.mxu1 %v1373_v5  ;;  %v1377_v8 = vld [vmem:[#allocation2 + $0x44] ss:$16 sps:$4 sm:$0xff]   ;;  %v1379_v9 = vld [vmem:[#allocation2 + $0x4c] ss:$16 sps:$4 sm:$0xff]   ;;  %v1381_v10 = vld [vmem:[#allocation2 + $0x40] ss:$16 sps:$4 sm:$0xff]  }
  0x2b   :  { %v1382_v11 = vld [vmem:[#allocation2 + $0x48] ss:$16 sps:$4 sm:$0xff]   ;;  %v1383_v12 = vld [vmem:[#allocation2 + $0x64] ss:$16 sps:$4 sm:$0xff]   ;;  %v1385_v13 = vld [vmem:[#allocation2 + $0x6c] ss:$16 sps:$4 sm:$0xff]  }
  0x2c   :  { %v1387_v14 = vld [vmem:[#allocation2 + $0x60] ss:$16 sps:$4 sm:$0xff]   ;;  %v1388_v15 = vld [vmem:[#allocation2 + $0x68] ss:$16 sps:$4 sm:$0xff]   ;;  %v1389_v16 = vld [vmem:[#allocation2 + $0x84] ss:$16 sps:$4 sm:$0xff]  }
  0x2d   :  { %443 = vmatpush1.bf16.msra.mxu0 %v1375_v6  ;;  %484 = vmatpush1.bf16.msra.mxu1 %v1376_v7  ;;  %v1391_v17 = vld [vmem:[#allocation2 + $0x8c] ss:$16 sps:$4 sm:$0xff]   ;;  %v1393_v18 = vld [vmem:[#allocation2 + $0x80] ss:$16 sps:$4 sm:$0xff]   ;;  %v1394_v19 = vld [vmem:[#allocation2 + $0x88] ss:$16 sps:$4 sm:$0xff]  }
  0x2e   :  { %444 = vmatprep.subr.bf16.mxu0 %v1377_v8  ;;  %485 = vmatprep.subr.bf16.mxu1 %v1379_v9  ;;  %v1395_v20 = vld [vmem:[#allocation2 + $0xa4] ss:$16 sps:$4 sm:$0xff]   ;;  %v1397_v21 = vld [vmem:[#allocation2 + $0xac] ss:$16 sps:$4 sm:$0xff]   ;;  %v1399_v22 = vld [vmem:[#allocation2 + $0xa0] ss:$16 sps:$4 sm:$0xff]  }
  0x2f   :  { %v1400_v23 = vld [vmem:[#allocation2 + $0xa8] ss:$16 sps:$4 sm:$0xff]   ;;  %v1401_v24 = vld [vmem:[#allocation2 + $0xc4] ss:$16 sps:$4 sm:$0xff]   ;;  %v1403_v25 = vld [vmem:[#allocation2 + $0xcc] ss:$16 sps:$4 sm:$0xff]  }
  0x30   :  { %v1405_v26 = vld [vmem:[#allocation2 + $0xc0] ss:$16 sps:$4 sm:$0xff]   ;;  %v1406_v27 = vld [vmem:[#allocation2 + $0xc8] ss:$16 sps:$4 sm:$0xff]   ;;  %v1407_v28 = vld [vmem:[#allocation2 + $0xe4] ss:$16 sps:$4 sm:$0xff]  }
  0x31   :  { %445 = vmatpush1.bf16.msra.mxu0 %v1381_v10  ;;  %486 = vmatpush1.bf16.msra.mxu1 %v1382_v11  ;;  %v1409_v29 = vld [vmem:[#allocation2 + $0xec] ss:$16 sps:$4 sm:$0xff]   ;;  %v1411_v30 = vld [vmem:[#allocation2 + $0xe0] ss:$16 sps:$4 sm:$0xff]   ;;  %v1412_v31 = vld [vmem:[#allocation2 + $0xe8] ss:$16 sps:$4 sm:$0xff]  }
  0x32   :  { %446 = vmatprep.subr.bf16.mxu0 %v1383_v12  ;;  %487 = vmatprep.subr.bf16.mxu1 %v1385_v13  ;;  %v1413_v32 = vld [vmem:[#allocation2 + $0x104] ss:$16 sps:$4 sm:$0xff]   ;;  %v1415_v33 = vld [vmem:[#allocation2 + $0x10c] ss:$16 sps:$4 sm:$0xff]   ;;  %v1417_v34 = vld [vmem:[#allocation2 + $0x100] ss:$16 sps:$4 sm:$0xff]  }
  0x33   :  { %v1418_v35 = vld [vmem:[#allocation2 + $0x108] ss:$16 sps:$4 sm:$0xff]   ;;  %v1419_v36 = vld [vmem:[#allocation2 + $0x124] ss:$16 sps:$4 sm:$0xff]   ;;  %v1421_v37 = vld [vmem:[#allocation2 + $0x12c] ss:$16 sps:$4 sm:$0xff]  }
  0x34   :  { %v1423_v38 = vld [vmem:[#allocation2 + $0x120] ss:$16 sps:$4 sm:$0xff]   ;;  %v1424_v39 = vld [vmem:[#allocation2 + $0x128] ss:$16 sps:$4 sm:$0xff]   ;;  %v1425_v40 = vld [vmem:[#allocation2 + $0x144] ss:$16 sps:$4 sm:$0xff]  }
  0x35   :  { %447 = vmatpush1.bf16.msra.mxu0 %v1387_v14  ;;  %488 = vmatpush1.bf16.msra.mxu1 %v1388_v15  ;;  %v1427_v41 = vld [vmem:[#allocation2 + $0x14c] ss:$16 sps:$4 sm:$0xff]   ;;  %v1429_v42 = vld [vmem:[#allocation2 + $0x140] ss:$16 sps:$4 sm:$0xff]   ;;  %v1430_v43 = vld [vmem:[#allocation2 + $0x148] ss:$16 sps:$4 sm:$0xff]  }
  0x36   :  { %448 = vmatprep.subr.bf16.mxu0 %v1389_v16  ;;  %489 = vmatprep.subr.bf16.mxu1 %v1391_v17  ;;  %v1431_v44 = vld [vmem:[#allocation2 + $0x164] ss:$16 sps:$4 sm:$0xff]   ;;  %v1433_v45 = vld [vmem:[#allocation2 + $0x16c] ss:$16 sps:$4 sm:$0xff]   ;;  %v1435_v46 = vld [vmem:[#allocation2 + $0x160] ss:$16 sps:$4 sm:$0xff]  }
  0x37   :  { %v1436_v47 = vld [vmem:[#allocation2 + $0x168] ss:$16 sps:$4 sm:$0xff]   ;;  %v1437_v49 = vld [vmem:[#allocation2 + $0x184] ss:$16 sps:$4 sm:$0xff]   ;;  %v1439_v50 = vld [vmem:[#allocation2 + $0x18c] ss:$16 sps:$4 sm:$0xff]  }
  0x38   :  { %v1700_v48 = vld [vmem:[%s1757_s0 + $0x8] sm:$0xff]  ;;  %v1441_v52 = vld [vmem:[#allocation2 + $0x180] ss:$16 sps:$4 sm:$0xff]   ;;  %v1443_v54 = vld [vmem:[#allocation2 + $0x1a4] ss:$16 sps:$4 sm:$0xff]   ;;  %v1635_v4 = vmov 0.0  }
  0x39   :  { %449 = vmatpush1.bf16.msra.mxu0 %v1393_v18  ;;  %490 = vmatpush1.bf16.msra.mxu1 %v1394_v19  ;;  %v55_v51 = vpack.c.bf16 %v1700_v48, %v1700_v48  ;;  %v1442_v53 = vld [vmem:[#allocation2 + $0x188] ss:$16 sps:$4 sm:$0xff]   ;;  %v1445_v55 = vld [vmem:[#allocation2 + $0x1ac] ss:$16 sps:$4 sm:$0xff]   ;;  %v1447_v56 = vld [vmem:[#allocation2 + $0x1a0] ss:$16 sps:$4 sm:$0xff]  }
  0x3a   :  { %450 = vmatprep.subr.bf16.mxu0 %v1395_v20  ;;  %491 = vmatprep.subr.bf16.mxu1 %v1397_v21  ;;  %v1448_v57 = vld [vmem:[#allocation2 + $0x1a8] ss:$16 sps:$4 sm:$0xff]   ;;  %v1449_v58 = vld [vmem:[#allocation2 + $0x1c4] ss:$16 sps:$4 sm:$0xff]   ;;  %v1451_v59 = vld [vmem:[#allocation2 + $0x1cc] ss:$16 sps:$4 sm:$0xff]  }
  0x3b   :  { %472 = vmatprep.mubr.bf16.mxu0 %v55_v51  ;;  %513 = vmatprep.mubr.bf16.mxu1 %v55_v51  ;;  %v1453_v60 = vld [vmem:[#allocation2 + $0x1c0] ss:$16 sps:$4 sm:$0xff]   ;;  %v1454_v61 = vld [vmem:[#allocation2 + $0x1c8] ss:$16 sps:$4 sm:$0xff]   ;;  %v1455_v62 = vld [vmem:[#allocation2 + $0x1e4] ss:$16 sps:$4 sm:$0xff]  }
  0x3c   :  { %v1457_v63 = vld [vmem:[#allocation2 + $0x1ec] ss:$16 sps:$4 sm:$0xff]   ;;  %v1459_v0 = vld [vmem:[#allocation2 + $0x1e0] ss:$16 sps:$4 sm:$0xff]   ;;  %v1460_v1 = vld [vmem:[#allocation2 + $0x1e8] ss:$16 sps:$4 sm:$0xff]  }
  0x3d   :  { %451 = vmatpush1.bf16.msra.mxu0 %v1399_v22  ;;  %492 = vmatpush1.bf16.msra.mxu1 %v1400_v23  ;;  %v1707_v2 = vld [vmem:[%s1757_s0] sm:$0xff]  ;;  %v1636_v6 = vmov 0   ;;  %v525_v7 = vld [vmem:[%s1762_s5 + $0x8] sm:$0xff]  ;;  %vm536_vm0 = vcmask 130048   ;;  %v1278_v20 = vld [vmem:[%s1762_s5 + $0x10] sm:$0xff] }
  0x3e   :  { %452 = vmatprep.subr.bf16.mxu0 %v1401_v24  ;;  %493 = vmatprep.subr.bf16.mxu1 %v1403_v25  ;;  %v54_v3 = vpack.c.bf16 %v1707_v2, %v1707_v2  ;;  %v524_v5 = vld [vmem:[%s1762_s5] sm:$0xff]  ;;  %v523_v19 = vld [vmem:[%s1760_s3 + $0x8] sm:$0xff]  ;;  %v1466_v23 = vld [vmem:[#allocation5 + $0x14] ss:$8 sps:$4 sm:$0xff]  }
  0x3f   :  { %1363 = vset.pattern.permute.xlu0 %v1636_v6  ;;  %1364 = vset.pattern.permute.xlu1 %v1636_v6  ;;  %v522_v18 = vld [vmem:[%s1760_s3] sm:$0xff]  ;;  %v1279_v24 = vld [vmem:[%s1762_s5 + $0x18] sm:$0xff] }
  0x40   :  { %528 = vperm.xlu0 %1363, %v524_v5   ;;  %v1461_v21 = vld [vmem:[#allocation5] ss:$8 sps:$4 sm:$0xff]   ;;  %631 = vperm.xlu1 %1364, %v1278_v20   ;;  %v1463_v22 = vld [vmem:[#allocation5 + $0x4] ss:$8 sps:$4 sm:$0xff]   ;;  %v1464_v25 = vld [vmem:[#allocation5 + $0x10] ss:$8 sps:$4 sm:$0xff]  }
  0x41   :  { %453 = vmatpush1.bf16.msra.mxu0 %v1405_v26  ;;  %494 = vmatpush1.bf16.msra.mxu1 %v1406_v27  ;;  %v1472_v26 = vld [vmem:[#allocation5 + $0x24] ss:$8 sps:$4 sm:$0xff]   ;;  %v1470_v27 = vld [vmem:[#allocation5 + $0x20] ss:$8 sps:$4 sm:$0xff]  }
  0x42   :  { %454 = vmatprep.subr.bf16.mxu0 %v1407_v28  ;;  %495 = vmatprep.subr.bf16.mxu1 %v1409_v29  ;;  %v1478_v28 = vld [vmem:[#allocation5 + $0x34] ss:$8 sps:$4 sm:$0xff]   ;;  %v1476_v29 = vld [vmem:[#allocation5 + $0x30] ss:$8 sps:$4 sm:$0xff]   ;;  %v1544_v51 = vld [vmem:[#allocation5 + $0xe4] ss:$8 sps:$4 sm:$0xff]  }
  0x43   :  { %v1505_v20 = vld [vmem:[#allocation5 + $0x164] ss:$8 sps:$4 sm:$0xff]  }
  0x44   :  { %533 = vperm.xlu0 %1363, %v525_v7   ;;  %636 = vperm.xlu1 %1364, %v1279_v24   ;;  %v1469_v7 = vld [vmem:[#allocation5 + $0x104] ss:$8 sps:$4 sm:$0xff]  }
  0x45   :  { %455 = vmatpush1.bf16.msra.mxu0 %v1411_v30  ;;  %496 = vmatpush1.bf16.msra.mxu1 %v1412_v31  ;;  %v1484_v30 = vld [vmem:[#allocation5 + $0x44] ss:$8 sps:$4 sm:$0xff]   ;;  %v1482_v31 = vld [vmem:[#allocation5 + $0x40] ss:$8 sps:$4 sm:$0xff]  }
  0x46   :  { %456 = vmatprep.subr.bf16.mxu0 %v1413_v32  ;;  %497 = vmatprep.subr.bf16.mxu1 %v1415_v33  ;;  %v1490_v32 = vld [vmem:[#allocation5 + $0x54] ss:$8 sps:$4 sm:$0xff]   ;;  %v1488_v33 = vld [vmem:[#allocation5 + $0x50] ss:$8 sps:$4 sm:$0xff]   ;;  %v1517_v24 = vld [vmem:[#allocation5 + $0x184] ss:$8 sps:$4 sm:$0xff]  }
  0x49   :  { %457 = vmatpush1.bf16.msra.mxu0 %v1417_v34  ;;  %498 = vmatpush1.bf16.msra.mxu1 %v1418_v35  ;;  %v1496_v34 = vld [vmem:[#allocation5 + $0x64] ss:$8 sps:$4 sm:$0xff]   ;;  %v1494_v35 = vld [vmem:[#allocation5 + $0x60] ss:$8 sps:$4 sm:$0xff]  }
  0x4a   :  { %458 = vmatprep.subr.bf16.mxu0 %v1419_v36  ;;  %499 = vmatprep.subr.bf16.mxu1 %v1421_v37  ;;  %v1502_v36 = vld [vmem:[#allocation5 + $0x74] ss:$8 sps:$4 sm:$0xff]   ;;  %v1500_v37 = vld [vmem:[#allocation5 + $0x70] ss:$8 sps:$4 sm:$0xff]  }
  0x4d   :  { %459 = vmatpush1.bf16.msra.mxu0 %v1423_v38  ;;  %500 = vmatpush1.bf16.msra.mxu1 %v1424_v39  ;;  %v1508_v38 = vld [vmem:[#allocation5 + $0x84] ss:$8 sps:$4 sm:$0xff]   ;;  %v1506_v39 = vld [vmem:[#allocation5 + $0x80] ss:$8 sps:$4 sm:$0xff]  }
  0x4e   :  { %460 = vmatprep.subr.bf16.mxu0 %v1425_v40  ;;  %501 = vmatprep.subr.bf16.mxu1 %v1427_v41  ;;  %v1514_v40 = vld [vmem:[#allocation5 + $0x94] ss:$8 sps:$4 sm:$0xff]   ;;  %v1512_v41 = vld [vmem:[#allocation5 + $0x90] ss:$8 sps:$4 sm:$0xff]  }
  0x51   :  { %461 = vmatpush1.bf16.msra.mxu0 %v1429_v42  ;;  %502 = vmatpush1.bf16.msra.mxu1 %v1430_v43  ;;  %v1520_v42 = vld [vmem:[#allocation5 + $0xa4] ss:$8 sps:$4 sm:$0xff]   ;;  %v1518_v43 = vld [vmem:[#allocation5 + $0xa0] ss:$8 sps:$4 sm:$0xff]  }
  0x52   :  { %462 = vmatprep.subr.bf16.mxu0 %v1431_v44  ;;  %503 = vmatprep.subr.bf16.mxu1 %v1433_v45  ;;  %v1526_v44 = vld [vmem:[#allocation5 + $0xb4] ss:$8 sps:$4 sm:$0xff]   ;;  %v1524_v45 = vld [vmem:[#allocation5 + $0xb0] ss:$8 sps:$4 sm:$0xff]  }
  0x55   :  { %463 = vmatpush1.bf16.msra.mxu0 %v1435_v46  ;;  %504 = vmatpush1.bf16.msra.mxu1 %v1436_v47  ;;  %v1532_v46 = vld [vmem:[#allocation5 + $0xc4] ss:$8 sps:$4 sm:$0xff]   ;;  %v1530_v47 = vld [vmem:[#allocation5 + $0xc0] ss:$8 sps:$4 sm:$0xff]  }
  0x56   :  { %464 = vmatprep.subr.bf16.mxu0 %v1437_v49  ;;  %505 = vmatprep.subr.bf16.mxu1 %v1439_v50  ;;  %v1538_v49 = vld [vmem:[#allocation5 + $0xd4] ss:$8 sps:$4 sm:$0xff]   ;;  %v1536_v50 = vld [vmem:[#allocation5 + $0xd0] ss:$8 sps:$4 sm:$0xff]  }
  0x59   :  { %465 = vmatpush1.bf16.msra.mxu0 %v1441_v52  ;;  %506 = vmatpush1.bf16.msra.mxu1 %v1442_v53  ;;  %v1542_v52 = vld [vmem:[#allocation5 + $0xe0] ss:$8 sps:$4 sm:$0xff]  }
  0x5a   :  { %466 = vmatprep.subr.bf16.mxu0 %v1443_v54  ;;  %507 = vmatprep.subr.bf16.mxu1 %v1445_v55 }
  0x5d   :  { %467 = vmatpush1.bf16.msra.mxu0 %v1447_v56  ;;  %508 = vmatpush1.bf16.msra.mxu1 %v1448_v57 }
  0x5e   :  { %468 = vmatprep.subr.bf16.mxu0 %v1449_v58  ;;  %509 = vmatprep.subr.bf16.mxu1 %v1451_v59 }
  0x61   :  { %469 = vmatpush1.bf16.msra.mxu0 %v1453_v60  ;;  %510 = vmatpush1.bf16.msra.mxu1 %v1454_v61 }
  0x62   :  { %470 = vmatprep.subr.bf16.mxu0 %v1455_v62  ;;  %511 = vmatprep.subr.bf16.mxu1 %v1457_v63 }
  0x65   :  { %471 = vmatpush1.bf16.msra.mxu0 %v1459_v0  ;;  %512 = vmatpush1.bf16.msra.mxu1 %v1460_v1 }
  0x68   :  { %473 = vmatmul.mubr.bf16.vlgmr.msra.gmra.mrb[0].mxu0 %v54_v3  ;;  %514 = vmatmul.mubr.bf16.vlgmr.msra.gmra.mrb[0].mxu1 %v54_v3 }
  0x69   :  { %607 = vmatprep.mubr.f32.mxu0 %v1635_v4  ;;  %709 = vmatprep.mubr.f32.mxu1 %v1635_v4 }
  0xbf   :  { %v529_v53 = vpop.permute.xlu0 %528 }
  0xc3   :  { %v534_v57 = vpop.permute.xlu0 %533 }
 0x13b   :  { %v474_v8 = vpop.f32.mrb[0].mxu0  ;;  %v515_v9 = vpop.f32.mrb[0].mxu1 }
 0x13c   :  { %v1348_v10 = vpack.c.bf16 %v515_v9, %v474_v8  ;;  %v476_v11 = vpop.f32.mrb[1].mxu0  ;;  %v517_v12 = vpop.f32.mrb[1].mxu1  ;;  %v624_v8 = vld [vmem:[%s1761_s4] sm:$0xff] }
 0x13d   :  { %v1346_v13 = vpack.c.bf16 %v517_v12, %v476_v11  ;;  %v478_v14 = vpop.f32.mrb[2].mxu0  ;;  %v519_v15 = vpop.f32.mrb[2].mxu1  ;;  %v1467_v9 = vld [vmem:[#allocation5 + $0x100] ss:$8 sps:$4 sm:$0xff]   ;;  %v1473_v12 = vld [vmem:[#allocation5 + $0x110] ss:$8 sps:$4 sm:$0xff]  }
 0x13e   :  { %v479_v16 = vpop.f32.mrb[3].mxu0  ;;  %v520_v17 = vpop.f32.mrb[3].mxu1  ;;  %v625_v11 = vld [vmem:[%s1761_s4 + $0x8] sm:$0xff]  ;;  %v1487_v15 = vld [vmem:[#allocation5 + $0x134] ss:$8 sps:$4 sm:$0xff]   ;;  %s1637_s4 = smov [#allocation7]  }
 0x13f   :  { %1347 = vmatprep.subr.bf16.mxu0 %v1346_v13  ;;  %v1481_v13 = vld [vmem:[#allocation5 + $0x124] ss:$8 sps:$4 sm:$0xff]   ;;  %v1479_v14 = vld [vmem:[#allocation5 + $0x120] ss:$8 sps:$4 sm:$0xff]   ;;  %v1485_v16 = vld [vmem:[#allocation5 + $0x130] ss:$8 sps:$4 sm:$0xff]  }
 0x140   :  { %1349 = vmatpush1.bf16.msra.mxu0 %v1348_v10  ;;  %v1475_v10 = vld [vmem:[#allocation5 + $0x114] ss:$8 sps:$4 sm:$0xff]   ;;  %v1493_v17 = vld [vmem:[#allocation5 + $0x144] ss:$8 sps:$4 sm:$0xff]   ;;  %s1202_s16 = sshll.u32 %s1637_s4, 4  ;;  %s1203_s16 = int_to_ptr.vmem [resolvable:$true] %s1202_s16 }
 0x141   :  { %1110 = vmatprep.subr.bf16.mxu0 %v1463_v22  ;;  %v1511_v22 = vld [vmem:[#allocation5 + $0x174] ss:$8 sps:$4 sm:$0xff]   ;;  %s1601_s17 = scalar_lea.vmem %s1203_s16, 256  ;;  %p1606_p3 = scmp.lt.s32.totalorder %s1203_s16, %s1203_s16 }
 0x142   :  { %p1602_p2 = scmp.ne.s32.totalorder %s1203_s16, %s1601_s17  ;;  %p1607_p4 = scmp.lt.s32.totalorder %s1601_s17, %s1601_s17 }
 0x143   :  { %1276 = vmatmul.mubr.msk.f32.vlgmr.msra.gmra.mrb[4].mxu0 %vm536_vm0, %v522_v18  ;;  %v1499_v18 = vld [vmem:[#allocation5 + $0x154] ss:$8 sps:$4 sm:$0xff]  }
 0x144   :  { %613 = vmatprep.mubr.f32.mxu0 %v1635_v4  ;;  %1111 = vmatpush1.bf16.msra.mxu0 %v1461_v21  ;;  %v1503_v21 = vld [vmem:[#allocation5 + $0x160] ss:$8 sps:$4 sm:$0xff]   ;;  %p1608_p5 = por %p1607_p4, %p1606_p3 }
 0x145   :  { %1112 = vmatprep.subr.bf16.mxu0 %v1466_v23  ;;  %v1509_v23 = vld [vmem:[#allocation5 + $0x170] ss:$8 sps:$4 sm:$0xff]  }
 0x146   :  { %p1609_p6 = pnand %p1608_p5, %p1602_p2 }
 0x147   :  { %1277 = vmatmul.mubr.msk.f32.gmra.mrb[6].mxu0 %vm536_vm0, %v523_v19  ;;  %v1497_v19 = vld [vmem:[#allocation5 + $0x150] ss:$8 sps:$4 sm:$0xff]  }
 0x148   :  { %1113 = vmatpush1.bf16.msra.mxu0 %v1464_v25  ;;  %v1515_v25 = vld [vmem:[#allocation5 + $0x180] ss:$8 sps:$4 sm:$0xff]  }
 0x149   :  { %1114 = vmatprep.subr.bf16.mxu0 %v1472_v26  ;;  %v1523_v26 = vld [vmem:[#allocation5 + $0x194] ss:$8 sps:$4 sm:$0xff]  }
 0x14c   :  { %1115 = vmatpush1.bf16.msra.mxu0 %v1470_v27  ;;  %v1521_v27 = vld [vmem:[#allocation5 + $0x190] ss:$8 sps:$4 sm:$0xff]  }
 0x14d   :  { %1116 = vmatprep.subr.bf16.mxu0 %v1478_v28  ;;  %v1529_v28 = vld [vmem:[#allocation5 + $0x1a4] ss:$8 sps:$4 sm:$0xff]  }
 0x150   :  { %1117 = vmatpush1.bf16.msra.mxu0 %v1476_v29  ;;  %v1527_v29 = vld [vmem:[#allocation5 + $0x1a0] ss:$8 sps:$4 sm:$0xff]  }
 0x151   :  { %1118 = vmatprep.subr.bf16.mxu0 %v1484_v30  ;;  %v1535_v30 = vld [vmem:[#allocation5 + $0x1b4] ss:$8 sps:$4 sm:$0xff]  }
 0x154   :  { %1119 = vmatpush1.bf16.msra.mxu0 %v1482_v31  ;;  %v1533_v31 = vld [vmem:[#allocation5 + $0x1b0] ss:$8 sps:$4 sm:$0xff]  }
 0x155   :  { %1120 = vmatprep.subr.bf16.mxu0 %v1490_v32  ;;  %v1541_v32 = vld [vmem:[#allocation5 + $0x1c4] ss:$8 sps:$4 sm:$0xff]  }
 0x158   :  { %1121 = vmatpush1.bf16.msra.mxu0 %v1488_v33  ;;  %v1539_v33 = vld [vmem:[#allocation5 + $0x1c0] ss:$8 sps:$4 sm:$0xff]  }
 0x159   :  { %1122 = vmatprep.subr.bf16.mxu0 %v1496_v34  ;;  %v1547_v34 = vld [vmem:[#allocation5 + $0x1d4] ss:$8 sps:$4 sm:$0xff]  }
 0x15c   :  { %1123 = vmatpush1.bf16.msra.mxu0 %v1494_v35  ;;  %v1545_v35 = vld [vmem:[#allocation5 + $0x1d0] ss:$8 sps:$4 sm:$0xff]  }
 0x15d   :  { %1124 = vmatprep.subr.bf16.mxu0 %v1502_v36  ;;  %v1550_v36 = vld [vmem:[#allocation5 + $0xf4] ss:$8 sps:$4 sm:$0xff]  }
 0x160   :  { %1125 = vmatpush1.bf16.msra.mxu0 %v1500_v37  ;;  %v1553_v37 = vld [vmem:[#allocation5 + $0x1e4] ss:$8 sps:$4 sm:$0xff]  }
 0x161   :  { %1126 = vmatprep.subr.bf16.mxu0 %v1508_v38  ;;  %v1548_v38 = vld [vmem:[#allocation5 + $0xf0] ss:$8 sps:$4 sm:$0xff]  }
 0x164   :  { %1127 = vmatpush1.bf16.msra.mxu0 %v1506_v39  ;;  %v1551_v39 = vld [vmem:[#allocation5 + $0x1e0] ss:$8 sps:$4 sm:$0xff]  }
 0x165   :  { %1128 = vmatprep.subr.bf16.mxu0 %v1514_v40  ;;  %v1556_v40 = vld [vmem:[#allocation5 + $0x1f4] ss:$8 sps:$4 sm:$0xff]  }
 0x168   :  { %1129 = vmatpush1.bf16.msra.mxu0 %v1512_v41  ;;  %v1554_v41 = vld [vmem:[#allocation5 + $0x1f0] ss:$8 sps:$4 sm:$0xff]  }
 0x169   :  { %1130 = vmatprep.subr.bf16.mxu0 %v1520_v42  ;;  %v632_v42 = vpop.permute.xlu1 %631 }
 0x16c   :  { %1131 = vmatpush1.bf16.msra.mxu0 %v1518_v43 }
 0x16d   :  { %1132 = vmatprep.subr.bf16.mxu0 %v1526_v44 }
 0x170   :  { %1133 = vmatpush1.bf16.msra.mxu0 %v1524_v45 }
 0x171   :  { %1134 = vmatprep.subr.bf16.mxu0 %v1532_v46 }
 0x174   :  { %1135 = vmatpush1.bf16.msra.mxu0 %v1530_v47 }
 0x175   :  { %1136 = vmatprep.subr.bf16.mxu0 %v1538_v49 }
 0x178   :  { %1137 = vmatpush1.bf16.msra.mxu0 %v1536_v50  ;;  %v637_v50 = vpop.permute.xlu1 %636 }
 0x179   :  { %1138 = vmatprep.subr.bf16.mxu0 %v1544_v51 }
 0x17c   :  { %1139 = vmatpush1.bf16.msra.mxu0 %v1542_v52 }
 0x17d   :  { %1140 = vmatprep.subr.bf16.mxu0 %v1550_v36 }
 0x180   :  { %1141 = vmatpush1.bf16.msra.mxu0 %v1548_v38 }
 0x216   :  { %v609_v54 = vpop.f32.mrb[4].mxu0 }
 0x217   :  { %v611_v55 = vpop.f32.mrb[5].mxu0  ;;  %v610_v56 = vadd.f32 %v609_v54, %v529_v53 }
 0x218   :  { %v612_v58 = vadd.f32 %v611_v55, %v529_v53 }
 0x219   :  { %v620_v63 = vmax.f32 %v610_v56, 0.0 }
 0x21a   :  { %v615_v59 = vpop.f32.mrb[6].mxu0  ;;  %v621_v1 = vmax.f32 %v612_v58, 0.0 }
 0x21b   :  { %v616_v60 = vadd.f32 %v615_v59, %v534_v57  ;;  %v617_v61 = vpop.f32.mrb[7].mxu0 }
 0x21c   :  { %v618_v62 = vadd.f32 %v617_v61, %v534_v57 }
 0x21d   :  { %v622_v0 = vmax.f32 %v616_v60, 0.0 }
 0x21e   :  { %v623_v3 = vmax.f32 %v618_v62, 0.0 }
 0x21f   :  { %v1352_v5 = vpack.c.bf16 %v622_v0, %v620_v63 }
 0x220   :  { %v1350_v6 = vpack.c.bf16 %v623_v3, %v621_v1 }
 0x222   :  { %1351 = vmatprep.subr.bf16.mxu1 %v1350_v6 }
 0x223   :  { %1353 = vmatpush1.bf16.msra.mxu1 %v1352_v5 }
 0x224   :  { %1151 = vmatprep.subr.bf16.mxu1 %v1469_v7 }
 0x226   :  { %1280 = vmatmul.mubr.msk.f32.vlgmr.msra.gmra.mrb[4].mxu1 %vm536_vm0, %v624_v8 }
 0x227   :  { %715 = vmatprep.mubr.f32.mxu1 %v1635_v4  ;;  %1152 = vmatpush1.bf16.msra.mxu1 %v1467_v9  ;;  %v1491_v4 = vld [vmem:[#allocation5 + $0x140] ss:$8 sps:$4 sm:$0xff]  }
 0x228   :  { %1153 = vmatprep.subr.bf16.mxu1 %v1475_v10 }
 0x22a   :  { %1281 = vmatmul.mubr.msk.f32.gmra.mrb[6].mxu1 %vm536_vm0, %v625_v11 }
 0x22b   :  { %1154 = vmatpush1.bf16.msra.mxu1 %v1473_v12 }
 0x22c   :  { %1155 = vmatprep.subr.bf16.mxu1 %v1481_v13 }
 0x22f   :  { %1156 = vmatpush1.bf16.msra.mxu1 %v1479_v14 }
 0x230   :  { %1157 = vmatprep.subr.bf16.mxu1 %v1487_v15 }
 0x233   :  { %1158 = vmatpush1.bf16.msra.mxu1 %v1485_v16 }
 0x234   :  { %1159 = vmatprep.subr.bf16.mxu1 %v1493_v17 }
 0x237   :  { %1160 = vmatpush1.bf16.msra.mxu1 %v1491_v4 }
 0x238   :  { %1161 = vmatprep.subr.bf16.mxu1 %v1499_v18 }
 0x23b   :  { %1162 = vmatpush1.bf16.msra.mxu1 %v1497_v19 }
 0x23c   :  { %1163 = vmatprep.subr.bf16.mxu1 %v1505_v20 }
 0x23f   :  { %1164 = vmatpush1.bf16.msra.mxu1 %v1503_v21 }
 0x240   :  { %1165 = vmatprep.subr.bf16.mxu1 %v1511_v22 }
 0x243   :  { %1166 = vmatpush1.bf16.msra.mxu1 %v1509_v23 }
 0x244   :  { %1167 = vmatprep.subr.bf16.mxu1 %v1517_v24 }
 0x247   :  { %1168 = vmatpush1.bf16.msra.mxu1 %v1515_v25 }
 0x248   :  { %1169 = vmatprep.subr.bf16.mxu1 %v1523_v26 }
 0x24b   :  { %1170 = vmatpush1.bf16.msra.mxu1 %v1521_v27 }
 0x24c   :  { %1171 = vmatprep.subr.bf16.mxu1 %v1529_v28 }
 0x24f   :  { %1172 = vmatpush1.bf16.msra.mxu1 %v1527_v29 }
 0x250   :  { %1173 = vmatprep.subr.bf16.mxu1 %v1535_v30 }
 0x253   :  { %1174 = vmatpush1.bf16.msra.mxu1 %v1533_v31 }
 0x254   :  { %1175 = vmatprep.subr.bf16.mxu1 %v1541_v32 }
 0x257   :  { %1176 = vmatpush1.bf16.msra.mxu1 %v1539_v33 }
 0x258   :  { %1177 = vmatprep.subr.bf16.mxu1 %v1547_v34 }
 0x25b   :  { %1178 = vmatpush1.bf16.msra.mxu1 %v1545_v35 }
 0x25c   :  { %1179 = vmatprep.subr.bf16.mxu1 %v1553_v37 }
 0x25f   :  { %1180 = vmatpush1.bf16.msra.mxu1 %v1551_v39 }
 0x260   :  { %1181 = vmatprep.subr.bf16.mxu1 %v1556_v40 }
 0x263   :  { %1182 = vmatpush1.bf16.msra.mxu1 %v1554_v41 }
 0x2f9   :  { %v711_v43 = vpop.f32.mrb[4].mxu1 }
 0x2fa   :  { %v712_v44 = vadd.f32 %v711_v43, %v632_v42  ;;  %v713_v45 = vpop.f32.mrb[5].mxu1 }
 0x2fb   :  { %v714_v46 = vadd.f32 %v713_v45, %v632_v42 }
 0x2fc   :  { %v722_v51 = vpack.c.bf16 %v712_v44, %v712_v44 }
 0x2fd   :  { %v723_v47 = vpack.c.bf16 %v714_v46, %v714_v46  ;;  %v717_v49 = vpop.f32.mrb[6].mxu1 }
 0x2fe   :  { %v718_v52 = vadd.f32 %v717_v49, %v637_v50  ;;  %v719_v53 = vpop.f32.mrb[7].mxu1 }
 0x2ff   :  { %v720_v54 = vadd.f32 %v719_v53, %v637_v50  ;;  %1142 = vmatprep.mubr.bf16.mxu0 %v723_v47 }
 0x300   :  { %1143 = vmatmul.mubr.bf16.vlgmr.msra.gmra.mrb[8].mxu0 %v722_v51  ;;  %v724_v56 = vpack.c.bf16 %v718_v52, %v718_v52 }
 0x301   :  { %v725_v55 = vpack.c.bf16 %v720_v54, %v720_v54 }
 0x303   :  { %1183 = vmatprep.mubr.bf16.mxu1 %v725_v55 }
 0x304   :  { %1184 = vmatmul.mubr.bf16.vlgmr.msra.gmra.mrb[8].mxu1 %v724_v56 }
 0x3d3   :  { %v1144_v57 = vpop.f32.mrb[8].mxu0 }
 0x3d4   :  { %v1146_v58 = vpop.f32.mrb[9].mxu0 }
 0x3d5   :  { %v1148_v59 = vpop.f32.mrb[10].mxu0 }
 0x3d6   :  { %v1149_v60 = vpop.f32.mrb[11].mxu0 }
 0x3d7   :  { %v1185_v61 = vpop.f32.mrb[8].mxu1 }
 0x3d8   :  { %v1186_v62 = vadd.f32 %v1185_v61, %v1144_v57  ;;  %v1187_v63 = vpop.f32.mrb[9].mxu1 }
 0x3d9   :  { %v1188_v0 = vadd.f32 %v1187_v63, %v1146_v58  ;;  %v1189_v1 = vpop.f32.mrb[10].mxu1 }
 0x3da   :  { %v1192_v3 = vadd.f32 %v1186_v62, %v1707_v2  ;;  %v1190_v5 = vpop.f32.mrb[11].mxu1 }
 0x3db   :  { %v1193_v6 = vadd.f32 %v1188_v0, %v1700_v48 }
 0x3dc   :  { %1194 = vst [vmem:[#allocation7] sm:$0xff] %v1192_v3 }
 0x3dd   :  { %1195 = vst [vmem:[#allocation7 + $0x8] sm:$0xff] %v1193_v6 }
 0x3de   :  { %1612 = shalt.err (!%p1609_p6)
}
 0x3df   :  { %s1613_s20 = scalar_lea.hbm %s1763_s6, 256 }
 0x3e0   :  { %p1614_p7 = scmp.ne.s32.totalorder %s1763_s6, %s1613_s20  ;;  %p1617_p8 = scmp.lt.u32.totalorder %s1613_s20, %s1763_s6 }
 0x3e2   :  { %p1619_p9 = pnand %p1617_p8, %p1614_p7 }
 0x3e4   :  { %1622 = shalt.err (!%p1619_p9)
}
 0x3e5   :  { %1205 = dma.vmem_to_hbm [thread:$0]  %s1203_s16, 256, %s1763_s6, [#allocation4]  }
 0x3e6   :  { %1627 = dma.done.wait [#allocation4], 256  }
 0x3e7   :  { %1628 = vsyncadd [#allocation4], 4294967040 }
 0x3e8   :  { %1209 = vsyncpa [#allocation3], 1 }
 0x3e9   :  { %1210 = vsyncpa [#allocation6], 1 }
 0x3ea   :  { %1211 = vsyncpa [#allocation4], 1 }

</bundles_post_ra>
